<compile_context>
chip_gen: v6e
topology: v6e:2x2x1
jax: 0.10.0
libtpu: 0.0.40
codegen_flags: <defaults>
</compile_context>

<pallas_src>
import functools
import math

import jax
import jax.numpy as jnp
import numpy as np
from jax.experimental import pallas as pl
from jax.experimental.pallas import tpu as pltpu


def _round_up(x, m):
    return (x + m - 1) // m * m


def _is_statically_zero(a):
    """True iff `a` is a concrete (non-traced) array that is all zeros."""
    try:
        return bool(np.all(np.asarray(a) == 0))
    except Exception:  # traced under jit -> cannot inspect, keep the add
        return False


def _ctle_fused_kernel(ids_ref, ts_ref, w_cat_ref, omega_ref, bias_ref, out_ref,
                       *, div_term, e_pad, add_bias):
    # ids_ref:   (TM, 1)            int32
    # ts_ref:    (TM, 1)            float32
    # w_cat_ref: (V_pad, 2*E_pad)   bfloat16  (hi plane || lo residual plane)
    # omega_ref: (1, E_pad)         float32
    # bias_ref:  (1, E_pad)         float32
    # out_ref:   (TM, E_pad)        out dtype
    v_pad = w_cat_ref.shape[0]

    # ---- token embedding: single one-hot gather matmul on the MXU ------------------
    ids = ids_ref[...]                                               # (TM, 1)
    vocab_row = jax.lax.broadcasted_iota(jnp.int32, (1, v_pad), 1)   # (1, V_pad)
    onehot = (ids == vocab_row).astype(jnp.bfloat16)                 # (TM, V_pad)
    tok_cat = jnp.dot(onehot, w_cat_ref[...],
                      preferred_element_type=jnp.float32)            # (TM, 2*E_pad)
    tok = tok_cat[:, :e_pad] + tok_cat[:, e_pad:]                    # hi + lo -> ~f32

    # ---- temporal encoding: sqrt(1/E) * cos(t * omega [+ bias]) --------------------
    arg = ts_ref[...] * omega_ref[...]                               # (TM, E_pad)
    if add_bias:
        arg = arg + bias_ref[...]
    pos = div_term * jnp.cos(arg)

    out_ref[...] = (tok + pos).astype(out_ref.dtype)


def _ctle_add_pos_kernel(tok_ref, ts_ref, omega_ref, bias_ref, out_ref,
                         *, div_term, add_bias):
    # Large-vocab path: token rows already gathered XLA-side, just fuse the
    # temporal encoding and the add.
    arg = ts_ref[...] * omega_ref[...]
    if add_bias:
        arg = arg + bias_ref[...]
    pos = div_term * jnp.cos(arg)
    out_ref[...] = (tok_ref[...].astype(jnp.float32) + pos).astype(out_ref.dtype)


def ctle_embedding(x, timestamp, token_weight, omega, bias, *,
                   row_tile=2048, vocab_threshold=4096, out_dtype=jnp.float32):
    """Fused CTLEEmbedding forward.

    x:            (B, L) int token ids in [0, num_vocab + 2)
    timestamp:    (B, L) float timestamps
    token_weight: (num_vocab + 2, E) float (row `num_vocab` is the zero padding row)
    omega, bias:  (E,) TemporalEncoding parameters
    returns:      (B, L, E) = token_weight[x] + sqrt(1/E)*cos(ts[...,None]*omega + bias)
    """
    B, L = x.shape
    V, E = token_weight.shape
    N = B * L
    div_term = math.sqrt(1.0 / E)

    E_pad = _round_up(E, 128)      # lane-dense stores / aligned hi||lo halves
    V_pad = _round_up(V, 128)      # MXU-aligned contraction dim

    # Path selection: keep the bf16 hi||lo table VMEM-resident only when small
    # (v7x 32 MiB scoped VMEM is the binding limit); otherwise gather XLA-side.
    table_bytes = V_pad * 2 * E_pad * 2
    use_fused_gather = (V <= vocab_threshold) and (table_bytes <= 4 * 1024 * 1024)

    # Row tile: multiple of 8 sublanes, big enough to amortize per-step overhead,
    # clamped so there are >= 2 grid steps (v7x has 2 TensorCores) and so the
    # (TM, V_pad) one-hot intermediate stays around 1 MiB.
    TM = min(row_tile, _round_up(N, 8))
    if N > 8:
        TM = min(TM, _round_up(-(-N // 2), 8))
    if use_fused_gather:
        TM = min(TM, max(256, ((1 << 20) // V_pad) // 8 * 8))
    TM = max(TM, 8)
    N_pad = _round_up(N, TM)
    grid = (N_pad // TM,)

    ids = x.reshape(N).astype(jnp.int32)
    ts = timestamp.reshape(N).astype(jnp.float32)
    if N_pad != N:
        ids = jnp.pad(ids, (0, N_pad - N))     # padded rows sliced off below
        ts = jnp.pad(ts, (0, N_pad - N))
    ids2 = ids.reshape(N_pad, 1)
    ts2 = ts.reshape(N_pad, 1)

    omega2 = jnp.pad(omega.reshape(1, E).astype(jnp.float32),
                     ((0, 0), (0, E_pad - E)))
    bias2 = jnp.pad(bias.reshape(1, E).astype(jnp.float32),
                    ((0, 0), (0, E_pad - E)))
    add_bias = not _is_statically_zero(bias)

    out_bytes = N_pad * E_pad * np.dtype(out_dtype).itemsize

    if use_fused_gather:
        # Split the f32 table into bf16 hi/lo planes (bf16 MXU reproduces the f32
        # rows to ~2^-17 rel err) and concatenate along E -> one 2E-wide matmul.
        w = token_weight.astype(jnp.float32)
        w_hi = w.astype(jnp.bfloat16)
        w_lo = (w - w_hi.astype(jnp.float32)).astype(jnp.bfloat16)
        pad_ve = ((0, V_pad - V), (0, E_pad - E))
        w_cat = jnp.concatenate([jnp.pad(w_hi, pad_ve), jnp.pad(w_lo, pad_ve)],
                                axis=1)                            # (V_pad, 2*E_pad)

        kernel = functools.partial(_ctle_fused_kernel, div_term=div_term,
                                   e_pad=E_pad, add_bias=add_bias)
        cost = pl.CostEstimate(
            flops=2 * N_pad * V_pad * 2 * E_pad + 4 * N_pad * E_pad,
            transcendentals=N_pad * E_pad,
            bytes_accessed=out_bytes + 8 * N_pad + table_bytes + 8 * E_pad,
        )
        out = pl.pallas_call(
            kernel,
            out_shape=jax.ShapeDtypeStruct((N_pad, E_pad), out_dtype),
            grid=grid,
            in_specs=[
                pl.BlockSpec((TM, 1), lambda i: (i, 0)),             # token ids
                pl.BlockSpec((TM, 1), lambda i: (i, 0)),             # timestamps
                pl.BlockSpec((V_pad, 2 * E_pad), lambda i: (0, 0)),  # hi||lo table
                pl.BlockSpec((1, E_pad), lambda i: (0, 0)),          # omega
                pl.BlockSpec((1, E_pad), lambda i: (0, 0)),          # bias
            ],
            out_specs=pl.BlockSpec((TM, E_pad), lambda i: (i, 0)),
            compiler_params=pltpu.CompilerParams(
                dimension_semantics=("parallel",)),
            cost_estimate=cost,
        )(ids2, ts2, w_cat, omega2, bias2)
    else:
        # Large-vocab fallback: XLA-side row gather feeding a stream-in BlockSpec.
        tok = jnp.take(token_weight.astype(jnp.float32), ids, axis=0)  # (N_pad, E)
        tok = jnp.pad(tok, ((0, 0), (0, E_pad - E)))

        kernel = functools.partial(_ctle_add_pos_kernel, div_term=div_term,
                                   add_bias=add_bias)
        cost = pl.CostEstimate(
            flops=4 * N_pad * E_pad,
            transcendentals=N_pad * E_pad,
            bytes_accessed=out_bytes + 4 * N_pad * E_pad + 4 * N_pad + 8 * E_pad,
        )
        out = pl.pallas_call(
            kernel,
            out_shape=jax.ShapeDtypeStruct((N_pad, E_pad), out_dtype),
            grid=grid,
            in_specs=[
                pl.BlockSpec((TM, E_pad), lambda i: (i, 0)),  # gathered token rows
                pl.BlockSpec((TM, 1), lambda i: (i, 0)),      # timestamps
                pl.BlockSpec((1, E_pad), lambda i: (0, 0)),   # omega
                pl.BlockSpec((1, E_pad), lambda i: (0, 0)),   # bias
            ],
            out_specs=pl.BlockSpec((TM, E_pad), lambda i: (i, 0)),
            compiler_params=pltpu.CompilerParams(
                dimension_semantics=("parallel",)),
            cost_estimate=cost,
        )(tok, ts2, omega2, bias2)

    out = out[:N, :E]
    return out.reshape(B, L, E)


if __name__ == "__main__":
    # Small shapes consistent with CTLE: batch=2, seq=8, embed_size=128 (CTLE default),
    # num_vocab=100 (-> vocab rows = num_vocab + 2, row `num_vocab` is padding).
    B, L, E = 2, 8, 128
    num_vocab = 100
    V = num_vocab + 2
    padding_idx = num_vocab

    key = jax.random.PRNGKey(0)
    k_ids, k_ts, k_w = jax.random.split(key, 3)

    x = jax.random.randint(k_ids, (B, L), 0, V, dtype=jnp.int32)
    x = x.at[0, -1].set(padding_idx)                 # exercise the padding token
    timestamp = jax.random.uniform(k_ts, (B, L), dtype=jnp.float32,
                                   minval=0.0, maxval=1e3)

    # nn.Embedding(num_vocab + 2, E, padding_idx=num_vocab): padding row is zeros.
    token_weight = 0.02 * jax.random.normal(k_w, (V, E), dtype=jnp.float32)
    token_weight = token_weight.at[padding_idx].set(0.0)

    # TemporalEncoding.__init__: omega = 1 / 10 ** linspace(0, 9, E); bias = zeros.
    omega = jnp.asarray(1.0 / 10.0 ** np.linspace(0.0, 9.0, E), dtype=jnp.float32)
    bias = jnp.zeros((E,), dtype=jnp.float32)

    # Pure-JAX reference: CTLEEmbedding.forward with TemporalEncoding.
    div_term = math.sqrt(1.0 / E)
    ref = token_weight[x] + div_term * jnp.cos(
        timestamp[..., None] * omega.reshape(1, 1, -1) + bias.reshape(1, 1, -1))
    ref = np.asarray(ref)

    # Fused path (VMEM-resident one-hot MXU gather).
    out = jax.block_until_ready(
        ctle_embedding(x, timestamp, token_weight, omega, bias))
    np.testing.assert_allclose(np.asarray(out), ref, rtol=1e-4, atol=1e-4)

    # Large-vocab fallback path (XLA gather + stream-in positional-encoding kernel).
    out2 = jax.block_until_ready(
        ctle_embedding(x, timestamp, token_weight, omega, bias, vocab_threshold=0))
    np.testing.assert_allclose(np.asarray(out2), ref, rtol=1e-4, atol=1e-4)

    print("KERNEL_OK")
</pallas_src>

<mosaic_0001>
module attributes {stable_mosaic.version = 11 : i64} {
  func.func @_ctle_fused_kernel(%arg0: i32, %arg1: memref<8x1xi32, #tpu.memory_space<vmem>>, %arg2: memref<8x1xf32, #tpu.memory_space<vmem>>, %arg3: memref<128x256xbf16, #tpu.memory_space<vmem>>, %arg4: memref<1x128xf32, #tpu.memory_space<vmem>>, %arg5: memref<1x128xf32, #tpu.memory_space<vmem>>, %arg6: memref<8x128xf32, #tpu.memory_space<vmem>>) attributes {dimension_semantics = [#tpu.dimension_semantics<parallel>], iteration_bounds = array<i64: 2>, scalar_prefetch = 0 : i64, scratch_operands = 0 : i64, tpu.core_type = #tpu.core_type<tc>, window_params = [{transform_indices = @transform_0, window_bounds = array<i64: 8, 1>}, {transform_indices = @transform_1, window_bounds = array<i64: 8, 1>}, {pipeline_mode = #tpu.pipeline_mode<synchronous>, transform_indices = @transform_2, window_bounds = array<i64: 128, 256>}, {pipeline_mode = #tpu.pipeline_mode<synchronous>, transform_indices = @transform_3, window_bounds = array<i64: 1, 128>}, {pipeline_mode = #tpu.pipeline_mode<synchronous>, transform_indices = @transform_4, window_bounds = array<i64: 1, 128>}, {transform_indices = @transform_5, window_bounds = array<i64: 8, 128>}]} {
    %c0 = arith.constant 0 : index
    %c0_0 = arith.constant 0 : index
    %0 = vector.load %arg1[%c0, %c0_0] : memref<8x1xi32, #tpu.memory_space<vmem>>, vector<8x1xi32>
    %1 = tpu.iota {dimensions = array<i32: 1>} : vector<1x128xi32>
    %2 = vector.broadcast %0 : vector<8x1xi32> to vector<8x128xi32>
    %3 = vector.broadcast %1 : vector<1x128xi32> to vector<8x128xi32>
    %4 = arith.cmpi eq, %2, %3 : vector<8x128xi32>
    %5 = arith.extui %4 : vector<8x128xi1> to vector<8x128xi32>
    %6 = arith.sitofp %5 : vector<8x128xi32> to vector<8x128xf32>
    %7 = arith.truncf %6 : vector<8x128xf32> to vector<8x128xbf16>
    %c0_1 = arith.constant 0 : index
    %c0_2 = arith.constant 0 : index
    %8 = vector.load %arg3[%c0_1, %c0_2] : memref<128x256xbf16, #tpu.memory_space<vmem>>, vector<128x256xbf16>
    %cst = arith.constant dense<0.000000e+00> : vector<8x256xf32>
    %9 = tpu.matmul %7, %8, %cst {dimension_numbers = #tpu.dot_dimension_numbers<[1], [0], [0], [1], [0, 0, 1, 1], [], []>} : vector<8x128xbf16>, vector<128x256xbf16>, vector<8x256xf32> -> vector<8x256xf32>
    %10 = vector.extract_strided_slice %9 {offsets = [0, 0], sizes = [8, 128], strides = [1, 1]} : vector<8x256xf32> to vector<8x128xf32>
    %11 = vector.extract_strided_slice %9 {offsets = [0, 128], sizes = [8, 128], strides = [1, 1]} : vector<8x256xf32> to vector<8x128xf32>
    %12 = arith.addf %10, %11 : vector<8x128xf32>
    %c0_3 = arith.constant 0 : index
    %c0_4 = arith.constant 0 : index
    %13 = vector.load %arg2[%c0_3, %c0_4] : memref<8x1xf32, #tpu.memory_space<vmem>>, vector<8x1xf32>
    %c0_5 = arith.constant 0 : index
    %c0_6 = arith.constant 0 : index
    %14 = vector.load %arg4[%c0_5, %c0_6] : memref<1x128xf32, #tpu.memory_space<vmem>>, vector<1x128xf32>
    %15 = vector.broadcast %13 : vector<8x1xf32> to vector<8x128xf32>
    %16 = vector.broadcast %14 : vector<1x128xf32> to vector<8x128xf32>
    %17 = arith.mulf %15, %16 : vector<8x128xf32>
    %18 = math.cos %17 : vector<8x128xf32>
    %cst_7 = arith.constant 0.0883883461 : f32
    %19 = vector.broadcast %cst_7 : f32 to vector<8x128xf32>
    %20 = arith.mulf %19, %18 : vector<8x128xf32>
    %21 = arith.addf %12, %20 : vector<8x128xf32>
    %c0_8 = arith.constant 0 : index
    %c0_9 = arith.constant 0 : index
    %22 = vector.load %arg6[%c0_8, %c0_9] : memref<8x128xf32, #tpu.memory_space<vmem>>, vector<8x128xf32>
    tpu.vector_store %arg6[%c0_8, %c0_9], %21 {strides = array<i32>} : memref<8x128xf32, #tpu.memory_space<vmem>>, vector<8x128xf32>,
    return
  }
  func.func @transform_0(%arg0: i32) -> (i32, i32) {
    %c0_i32 = arith.constant 0 : i32
    %c0_i32_0 = arith.constant 0 : i32
    return %arg0, %c0_i32 : i32, i32
  }
  func.func @transform_1(%arg0: i32) -> (i32, i32) {
    %c0_i32 = arith.constant 0 : i32
    %c0_i32_0 = arith.constant 0 : i32
    return %arg0, %c0_i32 : i32, i32
  }
  func.func @transform_2(%arg0: i32) -> (i32, i32) {
    %c0_i32 = arith.constant 0 : i32
    %c0_i32_0 = arith.constant 0 : i32
    %c0_i32_1 = arith.constant 0 : i32
    return %c0_i32, %c0_i32_0 : i32, i32
  }
  func.func @transform_3(%arg0: i32) -> (i32, i32) {
    %c0_i32 = arith.constant 0 : i32
    %c0_i32_0 = arith.constant 0 : i32
    %c0_i32_1 = arith.constant 0 : i32
    return %c0_i32, %c0_i32_0 : i32, i32
  }
  func.func @transform_4(%arg0: i32) -> (i32, i32) {
    %c0_i32 = arith.constant 0 : i32
    %c0_i32_0 = arith.constant 0 : i32
    %c0_i32_1 = arith.constant 0 : i32
    return %c0_i32, %c0_i32_0 : i32, i32
  }
  func.func @transform_5(%arg0: i32) -> (i32, i32) {
    %c0_i32 = arith.constant 0 : i32
    %c0_i32_0 = arith.constant 0 : i32
    return %arg0, %c0_i32 : i32, i32
  }
}

</mosaic_0001>

<bundles_post_ra>
// kernel: tpu_custom_call.1
= control target key start
LH: loop header
LB: loop body
LE: loop exit
PB: predicated region body
PF: predicated region fallthrough
CT: control target
= control target key end

     0   :  { %10 = vsyncpa [#allocation3], 0  ;;  %s1029_s0 = inlined_call_operand.vmem [shape: s32[16,1], index: 0, kind: input, shape index: {}]   ;;  %s1030_s1 = inlined_call_operand.vmem [shape: f32[16,1], index: 1, kind: input, shape index: {}]   ;;  %s1031_s2 = inlined_call_operand.hbm [shape: bf16[128,256], index: 2, kind: input, shape index: {}]   ;;  %s1032_s3 = inlined_call_operand.vmem [shape: f32[1,128], index: 3, kind: input, shape index: {}]   ;;  %s1033_s4 = inlined_call_operand.vmem [shape: f32[1,128], index: 4, kind: input, shape index: {}]   ;;  %s1034_s5 = inlined_call_operand.hbm [shape: f32[16,128], index: 5, kind: output, shape index: {}]  }
   0x1   :  { %11 = vsyncpa [#allocation4], 0 }
   0x2   :  { %13 = vsyncpa [#allocation4 + $0x1], 0  ;;  %s882_s18 = smov 0   ;;  %s884_s19 = smov 0  }
   0x3   :  { %s886_s20 = smov 0   ;;  %s888_s21 = smov 0  }
   0x4 LB: > { %s903_s4 = sadd.s32 4294967295, %s838_s21   ;;  %s618_s22 = sadd.s32 4294967294, %s838_s21   ;;  %s838_s21 = sphi %s888_s21, %s1042_s21   ;;  %s834_s20 = sphi %s886_s20, %s1041_s20   ;;  %s830_s19 = sphi %s884_s19, %s1040_s19   ;;  %s826_s18 = sphi %s882_s18, %s1039_s18  }
   0x5   : > { %s907_s23 = sadd.s32 1, %s838_s21   ;;  %s141_s24 = sadd.s32 1, %s834_s20 }
   0x6   : > { %s138_s25 = ssub.s32 %s838_s21, %s907_s23  ;;  %p151_p0 = scmp.ne.s32.totalorder %s834_s20, %s830_s19 }
   0x7   : > { %p139_p1 = scmp.eq.s32.totalorder %s138_s25, 0  ;;  %p152_p2 = scmp.eq.s32.totalorder %s903_s4, 1 }
   0x8   : > { %p157_p3 = scmp.ne.s32.totalorder %s830_s19, %s826_s18  ;;  %p158_p4 = scmp.eq.s32.totalorder %s618_s22, 1 }
   0x9   : > { %s918_s26 = scalar_select %p139_p1, %s834_s20, %s141_s24  }
   0xa   : > { %p920_p5 = por %p152_p2, %p151_p0  ;;  %p924_p6 = por %p158_p4, %p157_p3 }
   0xb   : > { %p619_p7 = scmp.ge.s32.totalorder %s838_s21, 1  ;;  %p165_p8 = scmp.lt.s32.totalorder %s838_s21, 3 }
   0xc   : > { %s1036_s28 = scalar_select %p924_p6, 1, 0 }
   0xd   : > { %p673_p9 = scmp.eq.s32.totalorder %s903_s4, 0  ;;  %p931_p10 = pnand %p619_p7, %p165_p8 }
   0xe   : > { %s840_s30 = smov [#allocation2]  }
   0xf   : > { %s177_s6 = sshll.u32 %s840_s30, 4  ;;  %p665_p11 = pneg %p931_p10  ;;  %s178_s6 = int_to_ptr.vmem [resolvable:$true] %s177_s6 }
  0x10   : > { %s759_s7 = scalar_lea.vmem %s178_s6, 2048  ;;  %p767_p3 = scmp.lt.s32.totalorder %s178_s6, %s178_s6 }
  0x11   : > { %p666_p12 = pnand %p673_p9, %p665_p11  ;;  %p760_p0 = scmp.ne.s32.totalorder %s178_s6, %s759_s7 }
  0x12   : > { %p768_p4 = scmp.lt.s32.totalorder %s759_s7, %s759_s7 }
  0x13   : > { %p750_p13 = pneg %p666_p12 }
  0x14   : > { %p769_p6 = por %p768_p4, %p767_p3 }
  0x15   : > { %p762_p1 = pnand %p760_p0, %p750_p13 }
  0x17   : > { %p763_p2 = pneg %p762_p1 }
  0x19   : > { %p770_p7 = pnand %p769_p6, %p763_p2 }
  0x1b   : > { %773 = shalt.err (!%p770_p7)
}
  0x1c   : > { %s841_s8 = smov 128   ;;  %s842_s9 = smov 8  }
  0x1d   : > { %668 = dma.hbm_to_vmem [thread:$0]  (!%p666_p12), %s1031_s2, 2048, %s178_s6, [#allocation3], %s841_s8, %s841_s8, %s842_s9  }
  0x1e   : > { %213 = sbr.rel (%p931_p10) target bundleno = 381 (0x17d), region = 40 }
  0x23   : > { %817 = dma.done.wait (%p673_p9), [#allocation3], 2048  }
  0x24   : > { %819 = vsyncadd (%p673_p9), [#allocation3], 4294965248  ;;  %p244_p8 = scmp.lt.s32.totalorder %s903_s4, 1  ;;  %v843_v0 = vmov 0   ;;  %v720_v3 = vld [vmem:[#allocation2 + $0x74] ss:$8 sps:$4 sm:$0xff]   ;;  %v254_v19 = vlaneseq }
  0x25   : > { %719 = vset.pattern.permute.xlu0 %v843_v0  ;;  %391 = vmatprep.mubr.bf16.mxu0 %v843_v0  ;;  %v722_v4 = vld [vmem:[#allocation2 + $0x70] ss:$8 sps:$4 sm:$0xff]   ;;  %v723_v5 = vld [vmem:[#allocation2 + $0x64] ss:$8 sps:$4 sm:$0xff]   ;;  %v725_v6 = vld [vmem:[#allocation2 + $0x60] ss:$8 sps:$4 sm:$0xff]  }
  0x26   : > { %s245_s12 = scalar_select %p244_p8, %s903_s4, 1  ;;  %359 = vmatprep.subr.bf16.mxu0 %v720_v3  ;;  %v726_v7 = vld [vmem:[#allocation2 + $0x54] ss:$8 sps:$4 sm:$0xff]   ;;  %v728_v8 = vld [vmem:[#allocation2 + $0x50] ss:$8 sps:$4 sm:$0xff]   ;;  %v255_v20 = vand.u32 127, %v254_v19 }
  0x27   : > { %360 = vmatpush1.bf16.msra.mxu0 %v722_v4  ;;  %v729_v9 = vld [vmem:[#allocation2 + $0x44] ss:$8 sps:$4 sm:$0xff]   ;;  %v731_v10 = vld [vmem:[#allocation2 + $0x40] ss:$8 sps:$4 sm:$0xff]   ;;  %v732_v11 = vld [vmem:[#allocation2 + $0x34] ss:$8 sps:$4 sm:$0xff]  }
  0x28   : > { %s625_s13 = sshll.u32 %s245_s12, 3  ;;  %361 = vmatprep.subr.bf16.mxu0 %v723_v5  ;;  %v734_v12 = vld [vmem:[#allocation2 + $0x30] ss:$8 sps:$4 sm:$0xff]   ;;  %v735_v13 = vld [vmem:[#allocation2 + $0x24] ss:$8 sps:$4 sm:$0xff]   ;;  %s241_s30 = sand.u32 1, %s830_s19  }
  0x29   : > { %s247_s16 = scalar_lea.vmem %s1029_s0, %s625_s13  ;;  %s251_s24 = scalar_lea.vmem %s1030_s1, %s625_s13  ;;  %v737_v14 = vld [vmem:[#allocation2 + $0x20] ss:$8 sps:$4 sm:$0xff]   ;;  %v738_v15 = vld [vmem:[#allocation2 + $0x14] ss:$8 sps:$4 sm:$0xff]   ;;  %v740_v16 = vld [vmem:[#allocation2 + $0x10] ss:$8 sps:$4 sm:$0xff]  }
  0x2a   : > { %v253_v1 = vld [vmem:[%s247_s16] sm:$0xff]  ;;  %v844_v22 = vmov 1.0|1.0   ;;  %v845_v33 = vmov 920167782   ;;  %s624_s6 = sshll.u32 %s241_s30, 3 }
  0x2b   : > { %v401_v2 = vld [vmem:[%s251_s24] sm:$0xff]  ;;  %257 = vperm.xlu0 %719, %v253_v1   ;;  %362 = vmatpush1.bf16.msra.mxu0 %v725_v6  ;;  %v846_v35 = vmov 1326507024   ;;  %v847_v39 = vmov 2102212464   ;;  %s652_s7 = sshll.u32 %s903_s4, 7 }
  0x2c   : > { %363 = vmatprep.subr.bf16.mxu0 %v726_v7  ;;  %v741_v17 = vld [vmem:[#allocation2 + $0x4] ss:$8 sps:$4 sm:$0xff]   ;;  %v743_v18 = vld [vmem:[#allocation2] ss:$8 sps:$4 sm:$0xff]   ;;  %v848_v41 = vmov 2475754826   ;;  %s994_s12 = scalar_lea.hbm %s1034_s5, %s652_s7 }
  0x2d   : > { %v646_v23 = vld [vmem:[%s1032_s3] ss:$0 sm:$0xff]  ;;  %v849_v43 = vmov 2131351028   ;;  %v850_v48 = vmov 683565275  }
  0x2e   : > { %s243_s8 = scalar_lea.vmem [#allocation5], %s624_s6  ;;  %s522_s13 = scalar_lea.sflag [#allocation4], %s241_s30 }
  0x2f   : > { %405 = vperm.xlu0 %719, %v401_v2   ;;  %364 = vmatpush1.bf16.msra.mxu0 %v728_v8  ;;  %s535_s9 = sshll.u32 %s243_s8, 4  ;;  %s851_s4 = smov [#allocation5]   ;;  %s536_s9 = int_to_ptr.vmem [resolvable:$true] %s535_s9 }
  0x30   : > { %365 = vmatprep.subr.bf16.mxu0 %v729_v9  ;;  %s774_s14 = scalar_lea.vmem %s536_s9, 128  ;;  %s778_s15 = sshll.u32 %s851_s4, 4  ;;  %s779_s15 = int_to_ptr.vmem [resolvable:$false] %s778_s15 }
  0x31   : > { %p775_p6 = scmp.ne.s32.totalorder %s536_s9, %s774_s14  ;;  %s780_s16 = scalar_lea.vmem %s779_s15, 256 }
  0x32   : > { %p781_p11 = scmp.lt.s32.totalorder %s536_s9, %s779_s15  ;;  %p782_p12 = scmp.lt.s32.totalorder %s780_s16, %s774_s14 }
  0x33   : > { %366 = vmatpush1.bf16.msra.mxu0 %v731_v10  ;;  %p776_p9 = pnand %p775_p6, %p920_p5 }
  0x34   : > { %367 = vmatprep.subr.bf16.mxu0 %v732_v11  ;;  %p783_p13 = por %p782_p12, %p781_p11 }
  0x35   : > { %p777_p10 = pneg %p776_p9 }
  0x37   : > { %368 = vmatpush1.bf16.msra.mxu0 %v734_v12  ;;  %p784_p0 = pnand %p783_p13, %p777_p10 }
  0x38   : > { %369 = vmatprep.subr.bf16.mxu0 %v735_v13 }
  0x3b   : > { %370 = vmatpush1.bf16.msra.mxu0 %v737_v14 }
  0x3c   : > { %371 = vmatprep.subr.bf16.mxu0 %v738_v15 }
  0x3f   : > { %372 = vmatpush1.bf16.msra.mxu0 %v740_v16 }
  0x40   : > { %373 = vmatprep.subr.bf16.mxu0 %v741_v17 }
  0x43   : > { %374 = vmatpush1.bf16.msra.mxu0 %v743_v18 }
  0xa6   : > { %v258_v21 = vpop.permute.xlu0 %257 }
  0xa7   : > { %vm259_vm0 = vcmp.eq.s32.totalorder %v258_v21, %v255_v20 }
  0xa8   : > { %vm644_vm1 = vmpackc.low %vm259_vm0, %vm259_vm0 }
  0xa9   : > { %645 = vmatmul.mubr.msk.bf16.vlgmr.msra.gmra.mxu0 %vm644_vm1, %v844_v22 }
  0xaa   : > { %v406_v24 = vpop.permute.xlu0 %405 }
  0xab   : > { %v959_v25 = vmul.f32 %v646_v23, %v406_v24 }
  0xad   : > { %v418_v26 = vand.u32 2139095040, %v959_v25  ;;  %v415_v37 = vand.u32 2147483647, %v959_v25  ;;  %vm417_vm9 = vcmp.lt.s32.totalorder %v959_v25, 0  ;;  %vm507_vm14 = vweird.f32 %v959_v25 }
  0xaf   : > { %v419_v27 = vshrl.u32 %v418_v26, 23  ;;  %v422_v53 = vand.u32 8388607, %v415_v37  ;;  %vm416_vm10 = vcmp.le.f32.partialorder %v415_v37, 0.7853982 }
  0xb1   : > { %v647_v28 = vadd.s32 4294967169, %v419_v27  ;;  %v423_v59 = vor.u32 8388608, %v422_v53 }
  0xb3   : > { %v425_v29 = vadd.s32 1, %v647_v28  ;;  %v463_v2 = vshll.u32 %v423_v59, 8 }
  0xb5   : > { %vm426_vm2 = vcmp.gt.s32.totalorder %v425_v29, 0 }
  0xb6   : > { %v427_v30 = vsel %vm426_vm2, %v425_v29, 0 }
  0xb7   : > { %v429_v31 = vand.u32 31, %v427_v30  ;;  %v428_v38 = vshrl.u32 %v427_v30, 5 }
  0xb9   : > { %v430_v32 = vsub.s32 32, %v429_v31  ;;  %v441_v40 = vshll.u32 %v847_v39, %v429_v31  ;;  %v444_v46 = vshll.u32 %v845_v33, %v429_v31  ;;  %v432_v49 = vshll.u32 %v850_v48, %v429_v31 }
  0xba   : > { %v435_v50 = vshll.u32 %v848_v41, %v429_v31  ;;  %v438_v51 = vshll.u32 %v849_v43, %v429_v31  ;;  %vm450_vm3 = vcmp.lt.s32.totalorder %v428_v38, 4  ;;  %vm447_vm4 = vcmp.lt.s32.totalorder %v428_v38, 1 }
  0xbb   : > { %v442_v34 = vshrl.u32 %v845_v33, %v430_v32  ;;  %v445_v36 = vshrl.u32 %v846_v35, %v430_v32  ;;  %v433_v42 = vshrl.u32 %v848_v41, %v430_v32  ;;  %v436_v44 = vshrl.u32 %v849_v43, %v430_v32 }
  0xbc   : > { %v439_v45 = vshrl.u32 %v847_v39, %v430_v32  ;;  %vm449_vm5 = vcmp.lt.s32.totalorder %v428_v38, 3  ;;  %vm448_vm6 = vcmp.lt.s32.totalorder %v428_v38, 2  ;;  %v431_v8 = vshrl.u32 %v850_v48, %v430_v32 }
  0xbd   : > { %v443_v47 = vor.u32 %v442_v34, %v441_v40  ;;  %v446_v52 = vor.u32 %v445_v36, %v444_v46  ;;  %v434_v54 = vor.u32 %v433_v42, %v432_v49  ;;  %v437_v55 = vor.u32 %v436_v44, %v435_v50 }
  0xbe   : > { %v440_v56 = vor.u32 %v439_v45, %v438_v51 }
  0xbf   : > { %v456_v57 = vsel %vm450_vm3, %v443_v47, 920167782  ;;  %v460_v58 = vsel %vm450_vm3, %v446_v52, 1326507024  ;;  %v455_v60 = vsel %vm447_vm4, %v434_v54, %v437_v55  ;;  %v451_v9 = vsel %vm447_vm4, %v431_v8, %v434_v54 }
  0xc0   : > { %v457_v61 = vsel %vm449_vm5, %v440_v56, %v456_v57  ;;  %v459_v62 = vsel %vm447_vm4, %v437_v55, %v440_v56  ;;  %v461_v63 = vsel %vm449_vm5, %v443_v47, %v460_v58  ;;  %v452_v7 = vsel %vm450_vm3, %v440_v56, 2102212464 }
  0xc1   : > { %v458_v0 = vsel %vm448_vm6, %v455_v60, %v457_v61  ;;  %v462_v1 = vsel %vm448_vm6, %v459_v62, %v461_v63  ;;  %v453_v10 = vsel %vm449_vm5, %v437_v55, %v452_v7 }
  0xc2   : > { %v971_v3 = vmul.u32.u64.low %v463_v2, %v458_v0  ;;  %v972_v4 = vmul.u32.u64.high %v463_v2, %v458_v0, %v971_v3  ;;  %v974_v5 = vmul.u32.u64.low %v463_v2, %v462_v1  ;;  %v975_v6 = vmul.u32.u64.high %v463_v2, %v462_v1, %v974_v5 }
  0xc3   : > { %v454_v12 = vsel %vm448_vm6, %v451_v9, %v453_v10 }
  0xc4   : > { %v473_v11 = vadd.s32 1, %v972_v4  ;;  %vm472_vm7 = vc.u32 %v975_v6, %v971_v3  ;;  %v470_v14 = vmul.u32 %v463_v2, %v454_v12  ;;  %v471_v29 = vadd.s32 %v971_v3, %v975_v6 }
  0xc6   : > { %v474_v13 = vsel %vm472_vm7, %v473_v11, %v972_v4 }
  0xc7   : > { %v475_v15 = vadd.s32 %v474_v13, %v470_v14 }
  0xc9   : > { %v476_v16 = vadd.s32 536870912, %v475_v15 }
  0xcb   : > { %v477_v17 = vshrl.u32 %v476_v16, 30 }
  0xcd   : > { %v478_v18 = vshll.u32 %v477_v17, 30  ;;  %v501_v42 = vsub.s32 4, %v477_v17 }
  0xcf   : > { %v479_v19 = vsub.s32 %v475_v15, %v478_v18  ;;  %v502_v43 = vsel %vm417_vm9, %v501_v42, %v477_v17 }
  0xd0   : > { %v504_v45 = vsel %vm416_vm10, 0, %v502_v43 }
  0xd1   : > { %v481_v20 = vsub.s32 0, %v479_v19  ;;  %v508_v47 = vand.u32 3, %v504_v45 }
  0xd3   : > { %v648_v21 = vmin.u32 %v481_v20, %v479_v19  ;;  %vm510_vm11 = vcmp.eq.s32.totalorder %v508_v47, 0  ;;  %vm513_vm12 = vcmp.eq.s32.totalorder %v508_v47, 2  ;;  %vm509_vm13 = vcmp.lt.s32.totalorder %v508_v47, 2 }
  0xd5   : > { %v483_v22 = vclz %v648_v21 }
  0xd7   : > { %v649_v23 = vadd.s32 4294967294, %v483_v22 }
  0xd9   : > { %vm650_vm8 = vcmp.lt.s32.totalorder %v649_v23, 0 }
  0xda   : > { %v486_v24 = vsel %vm650_vm8, 0, %v649_v23 }
  0xdb   : > { %v491_v26 = vsub.s32 4294967266, %v486_v24  ;;  %v487_v28 = vsub.s32 32, %v486_v24  ;;  %v488_v32 = vshll.u32 %v479_v19, %v486_v24 }
  0xdd   : > { %v492_v27 = vadd.s32 127, %v491_v26  ;;  %v489_v31 = vshrl.u32 %v471_v29, %v487_v28 }
  0xdf   : > { %v493_v30 = vshll.u32 %v492_v27, 23  ;;  %v490_v34 = vor.u32 %v489_v31, %v488_v32 }
  0xe1   : > { %v494_v33 = vor.u32 4788187, %v493_v30  ;;  %v497_v36 = vcvt.s32.f32 %v490_v34 }
  0xe3   : > { %v495_v35 = vand.u32 2147483647, %v494_v33 }
  0xe5   : > { %v498_v38 = vmul.f32 %v497_v36, %v495_v35 }
  0xe7   : > { %v499_v39 = vxor.u32 2147483648, %v498_v38 }
  0xe9   : > { %v500_v40 = vsel %vm417_vm9, %v499_v39, %v498_v38 }
  0xea   : > { %v503_v41 = vsel %vm416_vm10, %v959_v25, %v500_v40 }
  0xeb   : > { %744 = vcosq.f32 %v503_v41 }
  0xec   : > { %746 = vsinq.f32 %v503_v41 }
  0xf8   : > { %v745_v44 = vpop.eup %744 }
  0xf9   : > { %v747_v46 = vpop.eup %746  ;;  %v514_v49 = vxor.u32 2147483648, %v745_v44 }
  0xfa   : > { %v511_v48 = vxor.u32 2147483648, %v747_v46 }
  0xfb   : > { %v515_v51 = vsel %vm513_vm12, %v514_v49, %v747_v46 }
  0xfc   : > { %v512_v50 = vsel %vm510_vm11, %v745_v44, %v511_v48 }
  0xfd   : > { %v516_v37 = vsel %vm509_vm13, %v512_v50, %v515_v51 }
  0xfe   : > { %v517_v53 = vsel %vm507_vm14, nan, %v516_v37 }
  0xff   : > { %v518_v56 = vmul.f32 0.088388346, %v517_v53 }
 0x169   : > { %v393_v52 = vpop.f32.mrf.mxu0 }
 0x16b   : > { %v395_v54 = vpop.f32.mrf.mxu0 }
 0x16c   : > { %v400_v55 = vadd.f32 %v395_v54, %v393_v52 }
 0x16d   : > { %v397_v57 = vpop.f32.mrf.mxu0 }
 0x16e   : > { %v519_v58 = vadd.f32 %v518_v56, %v400_v55 }
 0x16f   : > { %v398_v59 = vpop.f32.mrf.mxu0 }
 0x170   : > { %520 = vst [vmem:[%s243_s8] sm:$0xff] %v519_v58 }
 0x171   : > { %787 = shalt.err (!%p784_p0)
}
 0x172   : > { %s788_s17 = scalar_lea.hbm %s994_s12, 128  ;;  %s792_s25 = scalar_lea.hbm %s1034_s5, 256 }
 0x173   : > { %p789_p1 = scmp.ne.s32.totalorder %s994_s12, %s788_s17  ;;  %p793_p4 = scmp.lt.s32.totalorder %s994_s12, %s1034_s5 }
 0x174   : > { %p794_p7 = scmp.lt.s32.totalorder %s792_s25, %s788_s17 }
 0x175   : > { %p790_p2 = pnand %p789_p1, %p920_p5 }
 0x176   : > { %p795_p8 = por %p794_p7, %p793_p4 }
 0x177   : > { %p791_p3 = pneg %p790_p2 }
 0x179   : > { %p796_p6 = pnand %p795_p8, %p791_p3 }
 0x17b   : > { %799 = shalt.err (!%p796_p6)
}
 0x17c   : > { %663 = dma.vmem_to_hbm [thread:$0]  (%p920_p5), %s536_s9, 128, %s994_s12, %s522_s13  }
 0x17d PF: > { %p675_p9 = scmp.ge.s32.totalorder %s838_s21, 2  ;;  %s547_s6 = sand.u32 1, %s826_s18  }
 0x17e   : > { %p1038_p10 = scmp.ne.s32.totalorder %s1036_s28, 0  ;;  %s548_s7 = scalar_lea.sflag [#allocation4], %s547_s6 }
 0x180   : > { %p670_p11 = pnand %p675_p9, %p1038_p10 }
 0x182   : > { %p671_p12 = pneg %p670_p11 }
 0x184   : > { %821 = dma.done.wait (%p671_p12), %s548_s7, 128  }
 0x185   : > { %823 = vsyncadd (%p671_p12), %s548_s7, 4294967168  ;;  %p16_p13 = scmp.ge.s32.totalorder %s907_s23, 4   ;;  %s1039_s18 = smov %s830_s19 }
 0x186   : > { %s1040_s19 = smov %s834_s20  ;;  %s1041_s20 = smov %s918_s26 }
 0x187   : > { %s1042_s21 = smov %s907_s23  ;;  %18 = sbr.rel (!%p16_p13) target bundleno = 4 (0x4), region = 83 }
 0x18c   :  { %553 = vsyncpa [#allocation3], 1 }
 0x18d   :  { %555 = vsyncpa [#allocation3 + $0x1], 1 }
 0x18e   :  { %556 = vsyncpa [#allocation4], 1 }
 0x18f   :  { %558 = vsyncpa [#allocation4 + $0x1], 1 }

</bundles_post_ra>
